<compile_context>
chip_gen: v5e
topology: v5e:2x2
jax: 0.10.0
libtpu: 0.0.40
codegen_flags: <defaults>
</compile_context>

<pallas_src>
import jax
import jax.numpy as jnp
from jax.experimental import pallas as pl
from jax.experimental.pallas import tpu as pltpu

_LANES = 128          # batch rows packed per lane row (lane-dense output)
_MIN_GRID_STEPS = 8   # target >= 4 grid steps per TensorCore on megacore parts


def _attention_kernel(x_ref, sm_ref, o_ref):
    """out[g, l] = sum_d x[g*128 + l, d] * softmax(w)[d] for one row block.

    x_ref : (tbr*128, D)  batch rows on sublanes, features on lanes
    sm_ref: (1, D)        softmax(attention_weights), float32 (precomputed)
    o_ref : (tbr, 128)    lane-dense per-row weighted sums
    """
    rows, d = x_ref.shape
    groups = rows // _LANES
    # Free relabel: splits the sublane axis on a 128-row (16-sublane) boundary.
    x3 = x_ref[...].reshape(groups, _LANES, d)
    # Multiply in the native dtype, accumulate in f32 (no full-tile f32 copy).
    sm = sm_ref[...].astype(x_ref.dtype)                   # (1, D) -> broadcast
    s = jnp.sum(x3 * sm, axis=-1, dtype=jnp.float32)       # VPU mul + XLU lane reduce
    o_ref[...] = s.astype(o_ref.dtype)


def _vmem_capacity_bytes():
    try:
        return int(pltpu.get_tpu_info().vmem_capacity_bytes)
    except Exception:
        return 64 * 1024 * 1024   # conservative fallback (v7x per-TC VMEM)


def _plan_tiling(num_groups, feature_dim, itemsize):
    """Pick groups-per-block (tbr), grid steps and a scoped-VMEM limit."""
    vmem_cap = _vmem_capacity_bytes()
    usable = int(vmem_cap * 0.70)                                   # headroom
    d_pad = ((feature_dim + _LANES - 1) // _LANES) * _LANES         # lane padding
    bytes_per_group = _LANES * d_pad * itemsize
    # Live VMEM per group: 2x input (double buffer) + ~1.5x in-kernel temporaries.
    live_per_group = int(bytes_per_group * 3.5)
    budget_groups = max(1, usable // max(1, live_per_group))

    tbr = max(1, min(budget_groups, pl.cdiv(num_groups, _MIN_GRID_STEPS)))
    if tbr < num_groups:
        tbr = max(8, (tbr // 8) * 8)     # 8-aligned sublane blocks, clean stores
    tbr = min(tbr, num_groups)
    grid_steps = pl.cdiv(num_groups, tbr)

    vmem_limit = int(min(vmem_cap * 0.9,
                         max(32 * 1024 * 1024, tbr * live_per_group * 1.25)))
    return tbr, grid_steps, vmem_limit


def _attention_pallas(x, sm):
    """Weighted feature-sums for the first (B // 128) * 128 rows of x."""
    b, d = x.shape
    num_groups = b // _LANES
    assert num_groups >= 1
    tbr, grid_steps, vmem_limit = _plan_tiling(num_groups, d, x.dtype.itemsize)
    rows_per_block = tbr * _LANES              # <= num_groups*128 <= b
    out_groups = grid_steps * tbr              # padded so output blocks divide exactly

    out = pl.pallas_call(
        _attention_kernel,
        out_shape=jax.ShapeDtypeStruct((out_groups, _LANES), x.dtype),
        grid=(grid_steps,),
        in_specs=[
            pl.BlockSpec((rows_per_block, d), lambda i: (i, 0)),
            pl.BlockSpec((1, d), lambda i: (0, 0)),
        ],
        out_specs=pl.BlockSpec((tbr, _LANES), lambda i: (i, 0)),
        compiler_params=pltpu.CompilerParams(
            dimension_semantics=("parallel",),   # independent steps: megacore split
            vmem_limit_bytes=vmem_limit,
        ),
    )(x, sm)
    return out.reshape(out_groups * _LANES)[: num_groups * _LANES]


def attention_forward(x, attention_weights):
    """x: (B, D), attention_weights: (D,)  ->  (B,) weighted feature sums."""
    b, d = x.shape
    assert attention_weights.shape == (d,)
    # Softmax of the tiny weight vector is precomputed once here, so every grid
    # step only does the multiply + lane reduce.
    sm = jax.nn.softmax(attention_weights.astype(jnp.float32), axis=0).reshape(1, d)

    if b < _LANES:
        # Tiny batch: pad only these <128 rows (negligible) to one lane group.
        x_pad = jnp.pad(x, ((0, _LANES - b), (0, 0)))
        return _attention_pallas(x_pad, sm)[:b]

    main_rows = (b // _LANES) * _LANES
    out_main = _attention_pallas(x, sm)          # no padding / no extra HBM pass
    if main_rows == b:
        return out_main
    # Ragged tail (< 128 rows): negligible traffic, plain-JAX fallback.
    tail = jnp.sum(x[main_rows:].astype(jnp.float32) * sm[0], axis=-1).astype(x.dtype)
    return jnp.concatenate([out_main, tail])


def attention_reference(x, attention_weights):
    weights = jax.nn.softmax(attention_weights, axis=0)
    return jnp.sum(x * weights, axis=1)


if __name__ == "__main__":
    key = jax.random.PRNGKey(0)
    k_w, k_x1, k_x2, k_x3 = jax.random.split(key, 4)

    # Toy shape implied by the module: x (batch, input_dim), weights (input_dim,)
    batch, input_dim = 8, 32
    w1 = jax.random.normal(k_w, (input_dim,), dtype=jnp.float32)
    x1 = jax.random.normal(k_x1, (batch, input_dim), dtype=jnp.float32)
    out1 = jax.block_until_ready(attention_forward(x1, w1))
    ref1 = attention_reference(x1, w1)
    assert out1.shape == (batch,)
    assert jnp.allclose(out1, ref1, atol=1e-5, rtol=1e-5)

    # Ragged batch: Pallas main part + tiny jnp tail (no full-array pad).
    b2, d2 = 300, 64
    w2 = jax.random.normal(k_w, (d2,), dtype=jnp.float32)
    x2 = jax.random.normal(k_x2, (b2, d2), dtype=jnp.float32)
    out2 = jax.block_until_ready(attention_forward(x2, w2))
    ref2 = attention_reference(x2, w2)
    assert out2.shape == (b2,)
    assert jnp.allclose(out2, ref2, atol=1e-5, rtol=1e-5)

    # Multi-step grid: 8-aligned row blocks, padded output, ragged last input block.
    b3, d3 = 2560, 96
    w3 = jax.random.normal(k_w, (d3,), dtype=jnp.float32)
    x3 = jax.random.normal(k_x3, (b3, d3), dtype=jnp.float32)
    out3 = jax.block_until_ready(attention_forward(x3, w3))
    ref3 = attention_reference(x3, w3)
    assert out3.shape == (b3,)
    assert jnp.allclose(out3, ref3, atol=1e-5, rtol=1e-5)

    print("KERNEL_OK")
</pallas_src>

<mosaic_0001>
module attributes {stable_mosaic.version = 11 : i64} {
  func.func @_attention_kernel(%arg0: i32, %arg1: memref<128x32xf32, #tpu.memory_space<vmem>>, %arg2: memref<1x32xf32, #tpu.memory_space<vmem>>, %arg3: memref<1x128xf32, #tpu.memory_space<vmem>>) attributes {dimension_semantics = [#tpu.dimension_semantics<parallel>], iteration_bounds = array<i64: 1>, scalar_prefetch = 0 : i64, scratch_operands = 0 : i64, tpu.core_type = #tpu.core_type<tc>, window_params = [{transform_indices = @transform_0, window_bounds = array<i64: 128, 32>}, {pipeline_mode = #tpu.pipeline_mode<synchronous>, transform_indices = @transform_1, window_bounds = array<i64: 1, 32>}, {transform_indices = @transform_2, window_bounds = array<i64: 1, 128>}]} {
    %c0 = arith.constant 0 : index
    %c0_0 = arith.constant 0 : index
    %0 = vector.load %arg1[%c0, %c0_0] : memref<128x32xf32, #tpu.memory_space<vmem>>, vector<128x32xf32>
    %1 = vector.shape_cast %0 : vector<128x32xf32> to vector<1x128x32xf32>
    %c0_1 = arith.constant 0 : index
    %c0_2 = arith.constant 0 : index
    %2 = vector.load %arg2[%c0_1, %c0_2] : memref<1x32xf32, #tpu.memory_space<vmem>>, vector<1x32xf32>
    %3 = vector.shape_cast %2 : vector<1x32xf32> to vector<1x1x32xf32>
    %4 = vector.broadcast %3 : vector<1x1x32xf32> to vector<1x128x32xf32>
    %5 = arith.mulf %1, %4 : vector<1x128x32xf32>
    %cst = arith.constant dense<0.000000e+00> : vector<1x128xf32>
    %6 = vector.multi_reduction <add>, %5, %cst [2] : vector<1x128x32xf32> to vector<1x128xf32>
    %c0_3 = arith.constant 0 : index
    %c0_4 = arith.constant 0 : index
    %7 = vector.load %arg3[%c0_3, %c0_4] : memref<1x128xf32, #tpu.memory_space<vmem>>, vector<1x128xf32>
    tpu.vector_store %arg3[%c0_3, %c0_4], %6 {strides = array<i32>} : memref<1x128xf32, #tpu.memory_space<vmem>>, vector<1x128xf32>,
    return
  }
  func.func @transform_0(%arg0: i32) -> (i32, i32) {
    %c0_i32 = arith.constant 0 : i32
    %c0_i32_0 = arith.constant 0 : i32
    return %arg0, %c0_i32 : i32, i32
  }
  func.func @transform_1(%arg0: i32) -> (i32, i32) {
    %c0_i32 = arith.constant 0 : i32
    %c0_i32_0 = arith.constant 0 : i32
    %c0_i32_1 = arith.constant 0 : i32
    return %c0_i32, %c0_i32_0 : i32, i32
  }
  func.func @transform_2(%arg0: i32) -> (i32, i32) {
    %c0_i32 = arith.constant 0 : i32
    %c0_i32_0 = arith.constant 0 : i32
    return %arg0, %c0_i32 : i32, i32
  }
}

</mosaic_0001>

<bundles_post_ra>
// kernel: tpu_custom_call.1
= control target key start
LH: loop header
LB: loop body
LE: loop exit
PB: predicated region body
PF: predicated region fallthrough
CT: control target
= control target key end

     0   :  { %vm48_vm0 = vcmask 261120   ;;  %s344_s0 = inlined_call_operand.vmem [shape: f32[128,32], index: 0, kind: input, shape index: {}]   ;;  %s345_s1 = inlined_call_operand.vmem [shape: f32[1,32], index: 1, kind: input, shape index: {}]   ;;  %s346_s2 = inlined_call_operand.hbm [shape: f32[1,128], index: 2, kind: output, shape index: {}]  }
   0x1   :  { %v12_v0 = vld [vmem:[%s344_s0] sm:$0xff]  ;;  %v14_v2 = vld [vmem:[%s344_s0 + $0x10] sm:$0xff]  ;;  %v13_v7 = vld [vmem:[%s344_s0 + $0x8] sm:$0xff] }
   0x2   :  { %v244_v1 = vld [vmem:[%s345_s1] ss:$0 sm:$0xff]  ;;  %v15_v8 = vld [vmem:[%s344_s0 + $0x18] sm:$0xff]  ;;  %v17_v12 = vld [vmem:[%s344_s0 + $0x28] sm:$0xff] }
   0x3   :  { %v16_v3 = vld [vmem:[%s344_s0 + $0x20] sm:$0xff]  ;;  %v32_v4 = vmul.f32 %v244_v1, %v12_v0  ;;  %v34_v5 = vmul.f32 %v244_v1, %v14_v2  ;;  %v33_v13 = vmul.f32 %v244_v1, %v13_v7  ;;  %v35_v14 = vmul.f32 %v244_v1, %v15_v8 }
   0x4   :  { %v36_v6 = vmul.f32 %v244_v1, %v16_v3 }
   0x5   :  { %v49_v9 = vsel %vm48_vm0, %v32_v4, 0.0  ;;  %v55_v10 = vsel %vm48_vm0, %v34_v5, 0.0 }
   0x6   :  { %v61_v11 = vsel %vm48_vm0, %v36_v6, 0.0  ;;  %50 = vadd.xlane.f32.xlu0 %v49_v9  ;;  %56 = vadd.xlane.f32.xlu1 %v55_v10 }
   0x7   :  { %62 = vadd.xlane.f32.xlu2 %v61_v11 }
   0x8   :  { %7 = vsyncpa [#allocation3], 0  ;;  %v37_v15 = vmul.f32 %v244_v1, %v17_v12  ;;  %v52_v16 = vsel %vm48_vm0, %v33_v13, 0.0  ;;  %v58_v17 = vsel %vm48_vm0, %v35_v14, 0.0  ;;  %v18_v19 = vld [vmem:[%s344_s0 + $0x30] sm:$0xff]  ;;  %v19_v20 = vld [vmem:[%s344_s0 + $0x38] sm:$0xff]  ;;  %v113_v49 = vlaneseq }
   0x9   :  { %v20_v21 = vld [vmem:[%s344_s0 + $0x40] sm:$0xff]  ;;  %v38_v22 = vmul.f32 %v244_v1, %v18_v19  ;;  %v39_v23 = vmul.f32 %v244_v1, %v19_v20  ;;  %v21_v28 = vld [vmem:[%s344_s0 + $0x48] sm:$0xff]  ;;  %v22_v29 = vld [vmem:[%s344_s0 + $0x50] sm:$0xff]  ;;  %vm118_vm1 = vcmask 130112   ;;  %vm122_vm2 = vcmask 195712   ;;  %s185_s17 = sshll.u32 %s346_s2, 4  ;;  %s186_s17 = int_to_ptr.hbm [resolvable:$true] %s185_s17 }
   0xa   :  { %v64_v18 = vsel %vm48_vm0, %v37_v15, 0.0  ;;  %v40_v24 = vmul.f32 %v244_v1, %v20_v21  ;;  %v23_v30 = vld [vmem:[%s344_s0 + $0x58] sm:$0xff]  ;;  %v41_v31 = vmul.f32 %v244_v1, %v21_v28  ;;  %v42_v32 = vmul.f32 %v244_v1, %v22_v29  ;;  %v24_v37 = vld [vmem:[%s344_s0 + $0x60] sm:$0xff]  ;;  %v25_v38 = vld [vmem:[%s344_s0 + $0x68] sm:$0xff] }
   0xb   :  { %v67_v25 = vsel %vm48_vm0, %v38_v22, 0.0  ;;  %v70_v26 = vsel %vm48_vm0, %v39_v23, 0.0  ;;  %v43_v33 = vmul.f32 %v244_v1, %v23_v30  ;;  %v26_v39 = vld [vmem:[%s344_s0 + $0x70] sm:$0xff]  ;;  %v44_v40 = vmul.f32 %v244_v1, %v24_v37  ;;  %v27_v46 = vld [vmem:[%s344_s0 + $0x78] sm:$0xff]  ;;  %s222_s0 = smov [#allocation2]  }
   0xc   :  { %v73_v27 = vsel %vm48_vm0, %v40_v24, 0.0  ;;  %v76_v34 = vsel %vm48_vm0, %v41_v31, 0.0  ;;  %v79_v35 = vsel %vm48_vm0, %v42_v32, 0.0  ;;  %v45_v41 = vmul.f32 %v244_v1, %v25_v38  ;;  %s183_s14 = sshll.u32 %s222_s0, 4  ;;  %s184_s14 = int_to_ptr.vmem [resolvable:$true] %s183_s14 }
   0xd   :  { %v82_v36 = vsel %vm48_vm0, %v43_v33, 0.0  ;;  %v46_v42 = vmul.f32 %v244_v1, %v26_v39  ;;  %v85_v43 = vsel %vm48_vm0, %v44_v40, 0.0  ;;  %v47_v47 = vmul.f32 %v244_v1, %v27_v46 }
   0xe   :  { %53 = vadd.xlane.f32.xlu0 %v52_v16  ;;  %59 = vadd.xlane.f32.xlu1 %v58_v17  ;;  %v88_v44 = vsel %vm48_vm0, %v45_v41, 0.0  ;;  %v323_v53 = vand.u32 127, %v113_v49  ;;  %vm126_vm3 = vcmask 261312   ;;  %vm130_vm4 = vcmask 326912  }
   0xf   :  { %65 = vadd.xlane.f32.xlu2 %v64_v18  ;;  %v91_v45 = vsel %vm48_vm0, %v46_v42, 0.0  ;;  %v94_v48 = vsel %vm48_vm0, %v47_v47, 0.0  ;;  %vm134_vm5 = vcmask 392512   ;;  %vm138_vm6 = vcmask 458112  }
  0x10   :  { %v116_v54 = vadd.s32 4294967288, %v323_v53  ;;  %v120_v55 = vadd.s32 4294967280, %v323_v53  ;;  %v124_v56 = vadd.s32 4294967272, %v323_v53  ;;  %v128_v1 = vadd.s32 4294967264, %v323_v53 }
  0x11   :  { %v132_v3 = vadd.s32 4294967256, %v323_v53  ;;  %v136_v4 = vadd.s32 4294967248, %v323_v53  ;;  %v140_v10 = vadd.s32 4294967240, %v323_v53  ;;  %v144_v14 = vadd.s32 4294967232, %v323_v53 }
  0x12   :  { %v148_v17 = vadd.s32 4294967224, %v323_v53  ;;  %vm142_vm7 = vcmask 523712   ;;  %v152_v21 = vadd.s32 4294967216, %v323_v53  ;;  %vm146_vm8 = vcmask 589312  }
  0x13   :  { %vm150_vm9 = vcmask 654912   ;;  %vm154_vm10 = vcmask 720512   ;;  %v160_v30 = vadd.s32 4294967200, %v323_v53  ;;  %v164_v32 = vadd.s32 4294967192, %v323_v53 }
  0x14   :  { %vm158_vm11 = vcmask 786112   ;;  %vm162_vm12 = vcmask 851712   ;;  %v168_v37 = vadd.s32 4294967184, %v323_v53  ;;  %vm166_vm13 = vcmask 917312  }
  0x15   :  { %v172_v42 = vadd.s32 4294967176, %v323_v53  ;;  %vm170_vm14 = vcmask 982912   ;;  %vm174_vm15 = vcmask 1048512  }
  0x16   :  { %68 = vadd.xlane.f32.xlu0 %v67_v25  ;;  %71 = vadd.xlane.f32.xlu1 %v70_v26  ;;  %v156_v26 = vadd.s32 4294967208, %v323_v53 }
  0x17   :  { %74 = vadd.xlane.f32.xlu2 %v73_v27 }
  0x1e   :  { %77 = vadd.xlane.f32.xlu0 %v76_v34  ;;  %80 = vadd.xlane.f32.xlu1 %v79_v35 }
  0x1f   :  { %83 = vadd.xlane.f32.xlu2 %v82_v36 }
  0x26   :  { %86 = vadd.xlane.f32.xlu0 %v85_v43  ;;  %89 = vadd.xlane.f32.xlu1 %v88_v44 }
  0x27   :  { %92 = vadd.xlane.f32.xlu2 %v91_v45 }
  0x2e   :  { %95 = vadd.xlane.f32.xlu0 %v94_v48 }
  0x79   :  { %v51_v50 = vpop.xlane.xlu0 %50  ;;  %v57_v51 = vpop.xlane.xlu1 %56 }
  0x7a   :  { %v63_v52 = vpop.xlane.xlu2 %62  ;;  %v115_v59 = vperm.slane %v51_v50, %v323_v53  ;;  %v121_v62 = vperm.slane %v57_v51, %v120_v55 }
  0x7b   :  { %v129_v6 = vperm.slane %v63_v52, %v128_v1 }
  0x81   :  { %v54_v57 = vpop.xlane.xlu0 %53  ;;  %v60_v58 = vpop.xlane.xlu1 %59 }
  0x82   :  { %v117_v60 = vperm.slane %v54_v57, %v116_v54  ;;  %v66_v61 = vpop.xlane.xlu2 %65  ;;  %v125_v0 = vperm.slane %v60_v58, %v124_v56 }
  0x83   :  { %v133_v9 = vperm.slane %v66_v61, %v132_v3 }
  0x84   :  { %v119_v63 = vsel %vm118_vm1, %v117_v60, %v115_v59 }
  0x85   :  { %v123_v2 = vsel %vm122_vm2, %v121_v62, %v119_v63 }
  0x86   :  { %v127_v5 = vsel %vm126_vm3, %v125_v0, %v123_v2 }
  0x87   :  { %v131_v12 = vsel %vm130_vm4, %v129_v6, %v127_v5 }
  0x88   :  { %v135_v15 = vsel %vm134_vm5, %v133_v9, %v131_v12 }
  0x89   :  { %v69_v7 = vpop.xlane.xlu0 %68  ;;  %v72_v8 = vpop.xlane.xlu1 %71 }
  0x8a   :  { %v75_v11 = vpop.xlane.xlu2 %74  ;;  %v137_v13 = vperm.slane %v69_v7, %v136_v4  ;;  %v141_v16 = vperm.slane %v72_v8, %v140_v10 }
  0x8b   :  { %v145_v19 = vperm.slane %v75_v11, %v144_v14 }
  0x8c   :  { %v139_v18 = vsel %vm138_vm6, %v137_v13, %v135_v15 }
  0x8d   :  { %v143_v23 = vsel %vm142_vm7, %v141_v16, %v139_v18 }
  0x8e   :  { %v147_v27 = vsel %vm146_vm8, %v145_v19, %v143_v23 }
  0x91   :  { %v78_v20 = vpop.xlane.xlu0 %77  ;;  %v81_v22 = vpop.xlane.xlu1 %80 }
  0x92   :  { %v149_v24 = vperm.slane %v78_v20, %v148_v17  ;;  %v84_v25 = vpop.xlane.xlu2 %83  ;;  %v153_v28 = vperm.slane %v81_v22, %v152_v21 }
  0x93   :  { %v157_v31 = vperm.slane %v84_v25, %v156_v26 }
  0x94   :  { %v151_v29 = vsel %vm150_vm9, %v149_v24, %v147_v27 }
  0x95   :  { %v155_v33 = vsel %vm154_vm10, %v153_v28, %v151_v29 }
  0x96   :  { %v159_v38 = vsel %vm158_vm11, %v157_v31, %v155_v33 }
  0x99   :  { %v87_v34 = vpop.xlane.xlu0 %86  ;;  %v90_v35 = vpop.xlane.xlu1 %89 }
  0x9a   :  { %v161_v36 = vperm.slane %v87_v34, %v160_v30  ;;  %v165_v39 = vperm.slane %v90_v35, %v164_v32  ;;  %v93_v40 = vpop.xlane.xlu2 %92 }
  0x9b   :  { %v169_v43 = vperm.slane %v93_v40, %v168_v37 }
  0x9c   :  { %v163_v41 = vsel %vm162_vm12, %v161_v36, %v159_v38 }
  0x9d   :  { %v167_v44 = vsel %vm166_vm13, %v165_v39, %v163_v41 }
  0x9e   :  { %v171_v47 = vsel %vm170_vm14, %v169_v43, %v167_v44 }
  0xa1   :  { %v96_v45 = vpop.xlane.xlu0 %95 }
  0xa2   :  { %v173_v46 = vperm.slane %v96_v45, %v172_v42 }
  0xa4   :  { %v175_v48 = vsel %vm174_vm15, %v173_v46, %v171_v47 }
  0xa5   :  { %177 = vst [vmem:[#allocation2] sm:$0x1] %v175_v48 }
  0xa6   :  { %188 = dma.vmem_to_hbm [thread:$0]  %s184_s14, 16, %s186_s17, [#allocation3]  }
  0xa7   :  { %220 = dma.done.wait [#allocation3], 16  }
  0xa8   :  { %221 = vsyncadd [#allocation3], 4294967280 }
  0xa9   :  { %193 = vsyncpa [#allocation3], 1 }

</bundles_post_ra>
